<compile_context>
chip_gen: v7x
topology: tpu7x:2x2x1
jax: 0.10.0
libtpu: 0.0.40
codegen_flags: <defaults>
</compile_context>

<pallas_src>
import functools

import jax
import jax.numpy as jnp
from jax.experimental import pallas as pl
from jax.experimental.pallas import tpu as pltpu


_COMPUTE_DTYPE = jnp.bfloat16   # MXU input dtype; accumulation stays f32


@functools.lru_cache(maxsize=None)
def _vmem_limit():
    """Generation-aware scoped-VMEM limit (leave compiler scratch headroom)."""
    cap = None
    try:
        cap = getattr(pltpu.get_tpu_info(), "vmem_capacity_bytes", None)
    except Exception:
        cap = None
    if cap is None:
        cap = 64 * 1024 * 1024          # conservative: v7x physical capacity
    # 3/4 of physical, clamped: ~48 MiB on v7x (64 MiB), ~96 MiB on v5e/v6e (128 MiB)
    return max(32 * 1024 * 1024, min(int(cap) * 3 // 4, 96 * 1024 * 1024))


def _round_up(x, m):
    return (x + m - 1) // m * m


def _pick_tile(dim, target, aligns=(256, 128, 8)):
    """Largest tile <= target dividing `dim`, preferring 256-alignment
    (full-height passes on the 2x256^2 MXUs; 256 is also 128-aligned for v5e).
    Falls back to the full dimension (always a legal block)."""
    if dim <= target:
        return dim
    for align in aligns:
        t = (target // align) * align
        while t >= align:
            if dim % t == 0:
                return t
            t -= align
    return dim


# ---------------------------------------------------------------------------
# Kernel 1/3: tiled dense (linear) layer  out = x @ w + b
#   Fast path: K fits in one pass -> 2-D grid, no accumulator, no pl.when.
#   General path: 3-D grid with f32 VMEM accumulator on the (last) K axis.
# ---------------------------------------------------------------------------
def _linear_kernel_noacc(x_ref, w_ref, b_ref, o_ref):
    acc = jnp.dot(x_ref[...], w_ref[...], preferred_element_type=jnp.float32)
    o_ref[...] = (acc + b_ref[...]).astype(o_ref.dtype)


def _linear_kernel_acc(x_ref, w_ref, b_ref, o_ref, acc_ref):
    k = pl.program_id(2)

    @pl.when(k == 0)
    def _init():
        acc_ref[...] = jnp.zeros_like(acc_ref)

    acc_ref[...] += jnp.dot(x_ref[...], w_ref[...],
                            preferred_element_type=jnp.float32)

    @pl.when(k == pl.num_programs(2) - 1)
    def _finalize():
        o_ref[...] = (acc_ref[...] + b_ref[...]).astype(o_ref.dtype)


def linear(x2d, w, b, out_dtype):
    M, K = x2d.shape
    K2, N = w.shape
    assert K == K2
    b2d = b.reshape(1, N).astype(jnp.float32)

    # Row-pad M so an aligned tile always divides it (no full-dim fallback /
    # VMEM blow-up for awkward M = B*tokens). Zero rows -> bias-only rows,
    # sliced off below.
    tm = min(512, _round_up(M, 8))
    Mp = _round_up(M, tm)
    x_in = jnp.pad(x2d, ((0, Mp - M), (0, 0))) if Mp != M else x2d

    tn = _pick_tile(N, 512, (256, 128))
    single_k_pass = K <= 2048           # ViT-B/L: K = 768/1024 -> one pass

    cost = pl.CostEstimate(
        flops=2 * Mp * N * K,
        transcendentals=0,
        bytes_accessed=(Mp * K * x_in.dtype.itemsize
                        + K * N * w.dtype.itemsize
                        + Mp * N * jnp.dtype(out_dtype).itemsize),
    )

    if single_k_pass:
        grid = (Mp // tm, N // tn)
        kernel = _linear_kernel_noacc
        in_specs = [
            pl.BlockSpec((tm, K), lambda i, j: (i, 0)),
            pl.BlockSpec((K, tn), lambda i, j: (0, j)),
            pl.BlockSpec((1, tn), lambda i, j: (0, j)),
        ]
        out_specs = pl.BlockSpec((tm, tn), lambda i, j: (i, j))
        scratch = []
        dims = ("parallel", "parallel")
    else:
        tk = _pick_tile(K, 1024, (256, 128))
        grid = (Mp // tm, N // tn, K // tk)
        kernel = _linear_kernel_acc
        in_specs = [
            pl.BlockSpec((tm, tk), lambda i, j, k: (i, k)),
            pl.BlockSpec((tk, tn), lambda i, j, k: (k, j)),
            pl.BlockSpec((1, tn), lambda i, j, k: (0, j)),
        ]
        out_specs = pl.BlockSpec((tm, tn), lambda i, j, k: (i, j))
        scratch = [pltpu.VMEM((tm, tn), jnp.float32)]
        dims = ("parallel", "parallel", "arbitrary")

    out = pl.pallas_call(
        kernel,
        out_shape=jax.ShapeDtypeStruct((Mp, N), out_dtype),
        grid=grid,
        in_specs=in_specs,
        out_specs=out_specs,
        scratch_shapes=scratch,
        compiler_params=pltpu.CompilerParams(
            dimension_semantics=dims,
            vmem_limit_bytes=_vmem_limit(),
        ),
        cost_estimate=cost,
    )(x_in, w, b2d)
    return out[:M] if Mp != M else out


# ---------------------------------------------------------------------------
# Kernel 2/3: attention core.
#   grid = (batch, head_group). Each step loads one contiguous [q|k|v] slab
#   for `group` heads (128-lane aligned when group*D % 128 == 0, which holds
#   for standard ViT D=64 with group=2), folds the softmax scale into q,
#   does the per-head softmax(q k^T) @ v in f32, and writes one full-width
#   (N, group*D) slab into the (B, N, C) output -- unmasked stores, output
#   already in the layout the projection expects.
# ---------------------------------------------------------------------------
def _attn_kernel(qkv_ref, o_ref, *, group, head_dim, scale):
    gD = group * head_dim
    # 128-lane-aligned slab loads (offsets 0, gD, 2*gD are 128-multiples for
    # standard ViT head dims; otherwise the slab is the full lane extent).
    q_slab = qkv_ref[0, :, 0 * gD:1 * gD]
    k_slab = qkv_ref[0, :, 1 * gD:2 * gD]
    v_slab = qkv_ref[0, :, 2 * gD:3 * gD]

    # Fold the softmax scale into q: N*gD multiplies instead of N^2 per head.
    q_slab = (q_slab.astype(jnp.float32) * scale).astype(q_slab.dtype)

    # TODO(synk): for very long sequences (high-res ViT, N >= 2048) add a
    # q-tile grid axis with flash-style online softmax over KV tiles instead
    # of materializing the (N, N) score matrix.
    outs = []
    for i in range(group):              # tiny static unroll (group=2 for D=64)
        lo = i * head_dim
        q = q_slab[:, lo:lo + head_dim]
        k = k_slab[:, lo:lo + head_dim]
        v = v_slab[:, lo:lo + head_dim]

        # q @ k^T without materializing the transpose (contract dim 1 of both).
        s = jax.lax.dot_general(
            q, k, dimension_numbers=(((1,), (1,)), ((), ())),
            preferred_element_type=jnp.float32)                  # (N, N) f32
        s = s - jnp.max(s, axis=-1, keepdims=True)               # stable softmax
        p = jnp.exp(s)
        p = p * pl.reciprocal(jnp.sum(p, axis=-1, keepdims=True), approx=True)

        outs.append(jnp.dot(p.astype(v.dtype), v,
                            preferred_element_type=jnp.float32))  # (N, D) f32

    o = outs[0] if group == 1 else jnp.concatenate(outs, axis=-1)  # (N, gD)
    o_ref[0, :, :] = o.astype(o_ref.dtype)       # single full-width slab store


def _head_group(num_heads, head_dim):
    """Smallest head group whose lane width is a multiple of 128; else all."""
    for g in range(1, num_heads + 1):
        if num_heads % g == 0 and (g * head_dim) % 128 == 0:
            return g
    return num_heads


def _head_group_permutation(num_heads, head_dim, group):
    """Column permutation of W_qkv / b_qkv: head-major [q|k|v] ->
    consecutive per-head-group [q_g|k_g|v_g] stripes of width 3*group*D.
    Identity when group == num_heads."""
    C = num_heads * head_dim
    perm = []
    for hg in range(num_heads // group):
        for qkv_i in range(3):
            base = qkv_i * C + hg * group * head_dim
            perm.extend(range(base, base + group * head_dim))
    return jnp.asarray(perm, dtype=jnp.int32)


def attention_core(qkv_grouped, num_heads, head_dim, group, scale, out_dtype):
    B, N, C3 = qkv_grouped.shape
    C = C3 // 3
    gD = group * head_dim
    n_groups = num_heads // group

    cost = pl.CostEstimate(
        flops=4 * B * num_heads * N * N * head_dim,
        transcendentals=B * num_heads * N * N,
        bytes_accessed=(B * N * C3 * qkv_grouped.dtype.itemsize
                        + B * N * C * jnp.dtype(out_dtype).itemsize),
    )
    return pl.pallas_call(
        functools.partial(_attn_kernel, group=group, head_dim=head_dim,
                          scale=scale),
        out_shape=jax.ShapeDtypeStruct((B, N, C), out_dtype),
        grid=(B, n_groups),
        in_specs=[pl.BlockSpec((1, N, 3 * gD), lambda b, hg: (b, 0, hg))],
        out_specs=pl.BlockSpec((1, N, gD), lambda b, hg: (b, 0, hg)),
        compiler_params=pltpu.CompilerParams(
            dimension_semantics=("parallel", "parallel"),
            vmem_limit_bytes=_vmem_limit(),
        ),
        cost_estimate=cost,
    )(qkv_grouped)


# ---------------------------------------------------------------------------
# Full module forward (glue in plain JAX; reshapes are free, no transposes).
# ---------------------------------------------------------------------------
def attention_forward(x, params, num_heads, compute_dtype=_COMPUTE_DTYPE):
    B, N, C = x.shape
    D = C // num_heads
    scale = float(D) ** (-0.5)
    group = _head_group(num_heads, D)

    # One-time column permutation of the QKV weights so the attention kernel
    # sees contiguous, lane-aligned per-head-group stripes (identity for the
    # group == num_heads fallback). Cheap: touches only (C, 3C) weights.
    perm = _head_group_permutation(num_heads, D, group)
    w_qkv = params["w_qkv"][:, perm].astype(compute_dtype)
    b_qkv = params["b_qkv"][perm]
    w_proj = params["w_proj"].astype(compute_dtype)

    x2d = x.reshape(B * N, C).astype(compute_dtype)

    # QKV projection (tiled Pallas matmul), bf16 activations out.
    qkv = linear(x2d, w_qkv, b_qkv, out_dtype=compute_dtype)     # (B*N, 3C)
    qkv = qkv.reshape(B, N, 3 * C)                               # free reshape

    # softmax(q k^T * scale) @ v; output lands directly in (B, N, C) layout.
    wf = attention_core(qkv, num_heads, D, group, scale,
                        out_dtype=compute_dtype)

    # Output projection. Dropout(p=0.0) is the identity.
    out = linear(wf.reshape(B * N, C), w_proj, params["b_proj"],
                 out_dtype=jnp.float32)
    return out.reshape(B, N, C)


# Pure-JAX reference (exact f32 semantics of the PyTorch module) for validation.
def attention_reference(x, params, num_heads):
    B, N, C = x.shape
    D = C // num_heads
    scale = float(D) ** (-0.5)
    qkv = x @ params["w_qkv"] + params["b_qkv"]
    qkv = qkv.reshape(B, N, 3, num_heads, D)
    q, k, v = (jnp.transpose(qkv[:, :, i], (0, 2, 1, 3)) for i in range(3))
    s = jnp.einsum("bhnd,bhmd->bhnm", q, k) * scale
    p = jax.nn.softmax(s, axis=-1)
    wf = jnp.einsum("bhnm,bhmd->bhnd", p, v)
    wf = jnp.transpose(wf, (0, 2, 1, 3)).reshape(B, N, C)
    return wf @ params["w_proj"] + params["b_proj"]


def init_params(key, feature_dim):
    k1, k2, k3, k4 = jax.random.split(key, 4)
    return {
        "w_qkv": 0.02 * jax.random.normal(k1, (feature_dim, 3 * feature_dim), jnp.float32),
        "b_qkv": 0.02 * jax.random.normal(k2, (3 * feature_dim,), jnp.float32),
        "w_proj": 0.02 * jax.random.normal(k3, (feature_dim, feature_dim), jnp.float32),
        "b_proj": 0.02 * jax.random.normal(k4, (feature_dim,), jnp.float32),
    }


if __name__ == "__main__":
    B, N, C, H = 2, 8, 32, 4  # batch, tokens, feature_dim, num_heads

    key = jax.random.PRNGKey(0)
    kx, kp = jax.random.split(key)
    x = jax.random.normal(kx, (B, N, C), jnp.float32)
    params = init_params(kp, C)

    fwd = jax.jit(functools.partial(attention_forward, num_heads=H))
    out = jax.block_until_ready(fwd(x, params))

    ref = attention_reference(x, params, H).astype(jnp.float32)
    assert out.shape == (B, N, C)
    max_err = float(jnp.max(jnp.abs(out - ref)))
    # bf16 MXU inputs with f32 accumulation vs a pure-f32 reference.
    assert jnp.allclose(out, ref, atol=3e-3, rtol=3e-2), \
        f"mismatch vs reference, max |err|={max_err}"

    print("KERNEL_OK")
</pallas_src>

<mosaic_0001>
module attributes {stable_mosaic.version = 11 : i64} {
  func.func @_linear_kernel_noacc(%arg0: i32, %arg1: i32, %arg2: memref<16x32xbf16, #tpu.memory_space<vmem>>, %arg3: memref<32x96xbf16, #tpu.memory_space<vmem>>, %arg4: memref<1x96xf32, #tpu.memory_space<vmem>>, %arg5: memref<16x96xbf16, #tpu.memory_space<vmem>>) attributes {dimension_semantics = [#tpu.dimension_semantics<parallel>, #tpu.dimension_semantics<parallel>], iteration_bounds = array<i64: 1, 1>, scalar_prefetch = 0 : i64, scratch_operands = 0 : i64, tpu.core_type = #tpu.core_type<tc>, window_params = [{transform_indices = @transform_0, window_bounds = array<i64: 16, 32>}, {transform_indices = @transform_1, window_bounds = array<i64: 32, 96>}, {transform_indices = @transform_2, window_bounds = array<i64: 1, 96>}, {transform_indices = @transform_3, window_bounds = array<i64: 16, 96>}]} {
    %c0 = arith.constant 0 : index
    %c0_0 = arith.constant 0 : index
    %0 = vector.load %arg2[%c0, %c0_0] : memref<16x32xbf16, #tpu.memory_space<vmem>>, vector<16x32xbf16>
    %c0_1 = arith.constant 0 : index
    %c0_2 = arith.constant 0 : index
    %1 = vector.load %arg3[%c0_1, %c0_2] : memref<32x96xbf16, #tpu.memory_space<vmem>>, vector<32x96xbf16>
    %cst = arith.constant dense<0.000000e+00> : vector<16x96xf32>
    %2 = tpu.matmul %0, %1, %cst {dimension_numbers = #tpu.dot_dimension_numbers<[1], [0], [0], [1], [0, 0, 1, 1], [], []>} : vector<16x32xbf16>, vector<32x96xbf16>, vector<16x96xf32> -> vector<16x96xf32>
    %c0_3 = arith.constant 0 : index
    %c0_4 = arith.constant 0 : index
    %3 = vector.load %arg4[%c0_3, %c0_4] : memref<1x96xf32, #tpu.memory_space<vmem>>, vector<1x96xf32>
    %4 = vector.broadcast %3 : vector<1x96xf32> to vector<16x96xf32>
    %5 = arith.addf %2, %4 : vector<16x96xf32>
    %6 = arith.truncf %5 : vector<16x96xf32> to vector<16x96xbf16>
    %c0_5 = arith.constant 0 : index
    %c0_6 = arith.constant 0 : index
    %7 = vector.load %arg5[%c0_5, %c0_6] : memref<16x96xbf16, #tpu.memory_space<vmem>>, vector<16x96xbf16>
    tpu.vector_store %arg5[%c0_5, %c0_6], %6 {strides = array<i32>} : memref<16x96xbf16, #tpu.memory_space<vmem>>, vector<16x96xbf16>,
    return
  }
  func.func @transform_0(%arg0: i32, %arg1: i32) -> (i32, i32) {
    %c0_i32 = arith.constant 0 : i32
    %c0_i32_0 = arith.constant 0 : i32
    return %arg0, %c0_i32 : i32, i32
  }
  func.func @transform_1(%arg0: i32, %arg1: i32) -> (i32, i32) {
    %c0_i32 = arith.constant 0 : i32
    %c0_i32_0 = arith.constant 0 : i32
    return %c0_i32, %arg1 : i32, i32
  }
  func.func @transform_2(%arg0: i32, %arg1: i32) -> (i32, i32) {
    %c0_i32 = arith.constant 0 : i32
    %c0_i32_0 = arith.constant 0 : i32
    return %c0_i32, %arg1 : i32, i32
  }
  func.func @transform_3(%arg0: i32, %arg1: i32) -> (i32, i32) {
    %c0_i32 = arith.constant 0 : i32
    return %arg0, %arg1 : i32, i32
  }
}

module attributes {stable_mosaic.version = 11 : i64} {
  func.func @_attn_kernel(%arg0: i32, %arg1: i32, %arg2: memref<1x8x96xbf16, #tpu.memory_space<vmem>>, %arg3: memref<1x8x32xbf16, #tpu.memory_space<vmem>>) attributes {dimension_semantics = [#tpu.dimension_semantics<parallel>, #tpu.dimension_semantics<parallel>], iteration_bounds = array<i64: 2, 1>, scalar_prefetch = 0 : i64, scratch_operands = 0 : i64, tpu.core_type = #tpu.core_type<tc>, window_params = [{transform_indices = @transform_0, window_bounds = array<i64: 1, 8, 96>}, {transform_indices = @transform_1, window_bounds = array<i64: 1, 8, 32>}]} {
    %c0 = arith.constant 0 : index
    %c0_0 = arith.constant 0 : index
    %c0_1 = arith.constant 0 : index
    %0 = vector.load %arg2[%c0, %c0_0, %c0_1] : memref<1x8x96xbf16, #tpu.memory_space<vmem>>, vector<1x8x32xbf16>
    %1 = vector.shape_cast %0 : vector<1x8x32xbf16> to vector<8x32xbf16>
    %c0_2 = arith.constant 0 : index
    %c0_3 = arith.constant 0 : index
    %c32 = arith.constant 32 : index
    %2 = vector.load %arg2[%c0_2, %c0_3, %c32] : memref<1x8x96xbf16, #tpu.memory_space<vmem>>, vector<1x8x32xbf16>
    %3 = vector.shape_cast %2 : vector<1x8x32xbf16> to vector<8x32xbf16>
    %c0_4 = arith.constant 0 : index
    %c0_5 = arith.constant 0 : index
    %c64 = arith.constant 64 : index
    %4 = vector.load %arg2[%c0_4, %c0_5, %c64] : memref<1x8x96xbf16, #tpu.memory_space<vmem>>, vector<1x8x32xbf16>
    %5 = vector.shape_cast %4 : vector<1x8x32xbf16> to vector<8x32xbf16>
    %6 = arith.extf %1 : vector<8x32xbf16> to vector<8x32xf32>
    %cst = arith.constant 0.353553385 : f32
    %7 = vector.broadcast %cst : f32 to vector<8x32xf32>
    %8 = arith.mulf %6, %7 : vector<8x32xf32>
    %9 = arith.truncf %8 : vector<8x32xf32> to vector<8x32xbf16>
    %10 = vector.extract_strided_slice %9 {offsets = [0, 0], sizes = [8, 8], strides = [1, 1]} : vector<8x32xbf16> to vector<8x8xbf16>
    %11 = vector.extract_strided_slice %3 {offsets = [0, 0], sizes = [8, 8], strides = [1, 1]} : vector<8x32xbf16> to vector<8x8xbf16>
    %12 = vector.extract_strided_slice %5 {offsets = [0, 0], sizes = [8, 8], strides = [1, 1]} : vector<8x32xbf16> to vector<8x8xbf16>
    %cst_6 = arith.constant dense<0.000000e+00> : vector<8x8xf32>
    %13 = tpu.matmul %10, %11, %cst_6 {dimension_numbers = #tpu.dot_dimension_numbers<[1], [1], [0], [0], [0, 0, 1, 0], [], []>} : vector<8x8xbf16>, vector<8x8xbf16>, vector<8x8xf32> -> vector<8x8xf32>
    %cst_7 = arith.constant dense<0xFF800000> : vector<8xf32>
    %14 = vector.multi_reduction <maximumf>, %13, %cst_7 [1] : vector<8x8xf32> to vector<8xf32>
    %15 = vector.shape_cast %14 : vector<8xf32> to vector<8x1xf32>
    %16 = vector.broadcast %15 : vector<8x1xf32> to vector<8x8xf32>
    %17 = arith.subf %13, %16 : vector<8x8xf32>
    %18 = math.exp %17 : vector<8x8xf32>
    %cst_8 = arith.constant dense<0.000000e+00> : vector<8xf32>
    %19 = vector.multi_reduction <add>, %18, %cst_8 [1] : vector<8x8xf32> to vector<8xf32>
    %20 = vector.shape_cast %19 : vector<8xf32> to vector<8x1xf32>
    %21 = tpu.reciprocal %20 {approx = true} : vector<8x1xf32> -> vector<8x1xf32>
    %22 = vector.broadcast %21 : vector<8x1xf32> to vector<8x8xf32>
    %23 = arith.mulf %18, %22 : vector<8x8xf32>
    %24 = arith.truncf %23 : vector<8x8xf32> to vector<8x8xbf16>
    %cst_9 = arith.constant dense<0.000000e+00> : vector<8x8xf32>
    %25 = tpu.matmul %24, %12, %cst_9 {dimension_numbers = #tpu.dot_dimension_numbers<[1], [0], [0], [1], [0, 0, 1, 1], [], []>} : vector<8x8xbf16>, vector<8x8xbf16>, vector<8x8xf32> -> vector<8x8xf32>
    %26 = vector.extract_strided_slice %9 {offsets = [0, 8], sizes = [8, 8], strides = [1, 1]} : vector<8x32xbf16> to vector<8x8xbf16>
    %27 = vector.extract_strided_slice %3 {offsets = [0, 8], sizes = [8, 8], strides = [1, 1]} : vector<8x32xbf16> to vector<8x8xbf16>
    %28 = vector.extract_strided_slice %5 {offsets = [0, 8], sizes = [8, 8], strides = [1, 1]} : vector<8x32xbf16> to vector<8x8xbf16>
    %cst_10 = arith.constant dense<0.000000e+00> : vector<8x8xf32>
    %29 = tpu.matmul %26, %27, %cst_10 {dimension_numbers = #tpu.dot_dimension_numbers<[1], [1], [0], [0], [0, 0, 1, 0], [], []>} : vector<8x8xbf16>, vector<8x8xbf16>, vector<8x8xf32> -> vector<8x8xf32>
    %cst_11 = arith.constant dense<0xFF800000> : vector<8xf32>
    %30 = vector.multi_reduction <maximumf>, %29, %cst_11 [1] : vector<8x8xf32> to vector<8xf32>
    %31 = vector.shape_cast %30 : vector<8xf32> to vector<8x1xf32>
    %32 = vector.broadcast %31 : vector<8x1xf32> to vector<8x8xf32>
    %33 = arith.subf %29, %32 : vector<8x8xf32>
    %34 = math.exp %33 : vector<8x8xf32>
    %cst_12 = arith.constant dense<0.000000e+00> : vector<8xf32>
    %35 = vector.multi_reduction <add>, %34, %cst_12 [1] : vector<8x8xf32> to vector<8xf32>
    %36 = vector.shape_cast %35 : vector<8xf32> to vector<8x1xf32>
    %37 = tpu.reciprocal %36 {approx = true} : vector<8x1xf32> -> vector<8x1xf32>
    %38 = vector.broadcast %37 : vector<8x1xf32> to vector<8x8xf32>
    %39 = arith.mulf %34, %38 : vector<8x8xf32>
    %40 = arith.truncf %39 : vector<8x8xf32> to vector<8x8xbf16>
    %cst_13 = arith.constant dense<0.000000e+00> : vector<8x8xf32>
    %41 = tpu.matmul %40, %28, %cst_13 {dimension_numbers = #tpu.dot_dimension_numbers<[1], [0], [0], [1], [0, 0, 1, 1], [], []>} : vector<8x8xbf16>, vector<8x8xbf16>, vector<8x8xf32> -> vector<8x8xf32>
    %42 = vector.extract_strided_slice %9 {offsets = [0, 16], sizes = [8, 8], strides = [1, 1]} : vector<8x32xbf16> to vector<8x8xbf16>
    %43 = vector.extract_strided_slice %3 {offsets = [0, 16], sizes = [8, 8], strides = [1, 1]} : vector<8x32xbf16> to vector<8x8xbf16>
    %44 = vector.extract_strided_slice %5 {offsets = [0, 16], sizes = [8, 8], strides = [1, 1]} : vector<8x32xbf16> to vector<8x8xbf16>
    %cst_14 = arith.constant dense<0.000000e+00> : vector<8x8xf32>
    %45 = tpu.matmul %42, %43, %cst_14 {dimension_numbers = #tpu.dot_dimension_numbers<[1], [1], [0], [0], [0, 0, 1, 0], [], []>} : vector<8x8xbf16>, vector<8x8xbf16>, vector<8x8xf32> -> vector<8x8xf32>
    %cst_15 = arith.constant dense<0xFF800000> : vector<8xf32>
    %46 = vector.multi_reduction <maximumf>, %45, %cst_15 [1] : vector<8x8xf32> to vector<8xf32>
    %47 = vector.shape_cast %46 : vector<8xf32> to vector<8x1xf32>
    %48 = vector.broadcast %47 : vector<8x1xf32> to vector<8x8xf32>
    %49 = arith.subf %45, %48 : vector<8x8xf32>
    %50 = math.exp %49 : vector<8x8xf32>
    %cst_16 = arith.constant dense<0.000000e+00> : vector<8xf32>
    %51 = vector.multi_reduction <add>, %50, %cst_16 [1] : vector<8x8xf32> to vector<8xf32>
    %52 = vector.shape_cast %51 : vector<8xf32> to vector<8x1xf32>
    %53 = tpu.reciprocal %52 {approx = true} : vector<8x1xf32> -> vector<8x1xf32>
    %54 = vector.broadcast %53 : vector<8x1xf32> to vector<8x8xf32>
    %55 = arith.mulf %50, %54 : vector<8x8xf32>
    %56 = arith.truncf %55 : vector<8x8xf32> to vector<8x8xbf16>
    %cst_17 = arith.constant dense<0.000000e+00> : vector<8x8xf32>
    %57 = tpu.matmul %56, %44, %cst_17 {dimension_numbers = #tpu.dot_dimension_numbers<[1], [0], [0], [1], [0, 0, 1, 1], [], []>} : vector<8x8xbf16>, vector<8x8xbf16>, vector<8x8xf32> -> vector<8x8xf32>
    %58 = vector.extract_strided_slice %9 {offsets = [0, 24], sizes = [8, 8], strides = [1, 1]} : vector<8x32xbf16> to vector<8x8xbf16>
    %59 = vector.extract_strided_slice %3 {offsets = [0, 24], sizes = [8, 8], strides = [1, 1]} : vector<8x32xbf16> to vector<8x8xbf16>
    %60 = vector.extract_strided_slice %5 {offsets = [0, 24], sizes = [8, 8], strides = [1, 1]} : vector<8x32xbf16> to vector<8x8xbf16>
    %cst_18 = arith.constant dense<0.000000e+00> : vector<8x8xf32>
    %61 = tpu.matmul %58, %59, %cst_18 {dimension_numbers = #tpu.dot_dimension_numbers<[1], [1], [0], [0], [0, 0, 1, 0], [], []>} : vector<8x8xbf16>, vector<8x8xbf16>, vector<8x8xf32> -> vector<8x8xf32>
    %cst_19 = arith.constant dense<0xFF800000> : vector<8xf32>
    %62 = vector.multi_reduction <maximumf>, %61, %cst_19 [1] : vector<8x8xf32> to vector<8xf32>
    %63 = vector.shape_cast %62 : vector<8xf32> to vector<8x1xf32>
    %64 = vector.broadcast %63 : vector<8x1xf32> to vector<8x8xf32>
    %65 = arith.subf %61, %64 : vector<8x8xf32>
    %66 = math.exp %65 : vector<8x8xf32>
    %cst_20 = arith.constant dense<0.000000e+00> : vector<8xf32>
    %67 = vector.multi_reduction <add>, %66, %cst_20 [1] : vector<8x8xf32> to vector<8xf32>
    %68 = vector.shape_cast %67 : vector<8xf32> to vector<8x1xf32>
    %69 = tpu.reciprocal %68 {approx = true} : vector<8x1xf32> -> vector<8x1xf32>
    %70 = vector.broadcast %69 : vector<8x1xf32> to vector<8x8xf32>
    %71 = arith.mulf %66, %70 : vector<8x8xf32>
    %72 = arith.truncf %71 : vector<8x8xf32> to vector<8x8xbf16>
    %cst_21 = arith.constant dense<0.000000e+00> : vector<8x8xf32>
    %73 = tpu.matmul %72, %60, %cst_21 {dimension_numbers = #tpu.dot_dimension_numbers<[1], [0], [0], [1], [0, 0, 1, 1], [], []>} : vector<8x8xbf16>, vector<8x8xbf16>, vector<8x8xf32> -> vector<8x8xf32>
    %74 = tpu.concatenate %25, %41, %57, %73 in 1 : vector<8x8xf32>, vector<8x8xf32>, vector<8x8xf32>, vector<8x8xf32> -> vector<8x32xf32>
    %75 = arith.truncf %74 : vector<8x32xf32> to vector<8x32xbf16>
    %c0_22 = arith.constant 0 : index
    %c0_23 = arith.constant 0 : index
    %c0_24 = arith.constant 0 : index
    %76 = vector.load %arg3[%c0_22, %c0_23, %c0_24] : memref<1x8x32xbf16, #tpu.memory_space<vmem>>, vector<1x8x32xbf16>
    %77 = vector.shape_cast %76 : vector<1x8x32xbf16> to vector<8x32xbf16>
    %78 = vector.shape_cast %75 : vector<8x32xbf16> to vector<1x8x32xbf16>
    tpu.vector_store %arg3[%c0_22, %c0_23, %c0_24], %78 {strides = array<i32>} : memref<1x8x32xbf16, #tpu.memory_space<vmem>>, vector<1x8x32xbf16>,
    return
  }
  func.func @transform_0(%arg0: i32, %arg1: i32) -> (i32, i32, i32) {
    %c0_i32 = arith.constant 0 : i32
    %c0_i32_0 = arith.constant 0 : i32
    return %arg0, %c0_i32, %arg1 : i32, i32, i32
  }
  func.func @transform_1(%arg0: i32, %arg1: i32) -> (i32, i32, i32) {
    %c0_i32 = arith.constant 0 : i32
    %c0_i32_0 = arith.constant 0 : i32
    return %arg0, %c0_i32, %arg1 : i32, i32, i32
  }
}

module attributes {stable_mosaic.version = 11 : i64} {
  func.func @_linear_kernel_noacc(%arg0: i32, %arg1: i32, %arg2: memref<16x32xbf16, #tpu.memory_space<vmem>>, %arg3: memref<32x32xbf16, #tpu.memory_space<vmem>>, %arg4: memref<1x32xf32, #tpu.memory_space<vmem>>, %arg5: memref<16x32xf32, #tpu.memory_space<vmem>>) attributes {dimension_semantics = [#tpu.dimension_semantics<parallel>, #tpu.dimension_semantics<parallel>], iteration_bounds = array<i64: 1, 1>, scalar_prefetch = 0 : i64, scratch_operands = 0 : i64, tpu.core_type = #tpu.core_type<tc>, window_params = [{transform_indices = @transform_0, window_bounds = array<i64: 16, 32>}, {transform_indices = @transform_1, window_bounds = array<i64: 32, 32>}, {transform_indices = @transform_2, window_bounds = array<i64: 1, 32>}, {transform_indices = @transform_3, window_bounds = array<i64: 16, 32>}]} {
    %c0 = arith.constant 0 : index
    %c0_0 = arith.constant 0 : index
    %0 = vector.load %arg2[%c0, %c0_0] : memref<16x32xbf16, #tpu.memory_space<vmem>>, vector<16x32xbf16>
    %c0_1 = arith.constant 0 : index
    %c0_2 = arith.constant 0 : index
    %1 = vector.load %arg3[%c0_1, %c0_2] : memref<32x32xbf16, #tpu.memory_space<vmem>>, vector<32x32xbf16>
    %cst = arith.constant dense<0.000000e+00> : vector<16x32xf32>
    %2 = tpu.matmul %0, %1, %cst {dimension_numbers = #tpu.dot_dimension_numbers<[1], [0], [0], [1], [0, 0, 1, 1], [], []>} : vector<16x32xbf16>, vector<32x32xbf16>, vector<16x32xf32> -> vector<16x32xf32>
    %c0_3 = arith.constant 0 : index
    %c0_4 = arith.constant 0 : index
    %3 = vector.load %arg4[%c0_3, %c0_4] : memref<1x32xf32, #tpu.memory_space<vmem>>, vector<1x32xf32>
    %4 = vector.broadcast %3 : vector<1x32xf32> to vector<16x32xf32>
    %5 = arith.addf %2, %4 : vector<16x32xf32>
    %c0_5 = arith.constant 0 : index
    %c0_6 = arith.constant 0 : index
    %6 = vector.load %arg5[%c0_5, %c0_6] : memref<16x32xf32, #tpu.memory_space<vmem>>, vector<16x32xf32>
    tpu.vector_store %arg5[%c0_5, %c0_6], %5 {strides = array<i32>} : memref<16x32xf32, #tpu.memory_space<vmem>>, vector<16x32xf32>,
    return
  }
  func.func @transform_0(%arg0: i32, %arg1: i32) -> (i32, i32) {
    %c0_i32 = arith.constant 0 : i32
    %c0_i32_0 = arith.constant 0 : i32
    return %arg0, %c0_i32 : i32, i32
  }
  func.func @transform_1(%arg0: i32, %arg1: i32) -> (i32, i32) {
    %c0_i32 = arith.constant 0 : i32
    %c0_i32_0 = arith.constant 0 : i32
    return %c0_i32, %arg1 : i32, i32
  }
  func.func @transform_2(%arg0: i32, %arg1: i32) -> (i32, i32) {
    %c0_i32 = arith.constant 0 : i32
    %c0_i32_0 = arith.constant 0 : i32
    return %c0_i32, %arg1 : i32, i32
  }
  func.func @transform_3(%arg0: i32, %arg1: i32) -> (i32, i32) {
    %c0_i32 = arith.constant 0 : i32
    return %arg0, %arg1 : i32, i32
  }
}

</mosaic_0001>

<bundles_post_ra>
// kernel: attention_forward.3
= control target key start
LH: loop header
LB: loop body
LE: loop exit
PB: predicated region body
PF: predicated region fallthrough
CT: control target
= control target key end

     0   :  { %v130_v0 = vmov 0.0   ;;  %vm131_vm0 = vmmov 0   ;;  %vm45_vm1 = vcmask 261120   ;;  %vm98_vm2 = vcmask 781312   ;;  %s170_s1 = inlined_call_operand.vmem [shape: bf16[32,96], index: 1, kind: input, shape index: {}]   ;;  %s171_s0 = inlined_call_operand.vmem [shape: bf16[16,32], index: 0, kind: input, shape index: {}]   ;;  %s172_s2 = inlined_call_operand.vmem [shape: f32[1,96], index: 2, kind: input, shape index: {}]   ;;  %s173_s3 = inlined_call_operand.vmem [shape: bf16[16,96], index: 3, kind: output, shape index: {}]  }
   0x1   :  { %117 = vmatprep.subr.bf16.mxu0 %v130_v0  ;;  %v127_v1 = vld [vmem:[%s170_s1] sm:$0xff]   ;;  %121 = vmatprep.mubr.msk.bf16.mxu0 %vm131_vm0, %v130_v0  ;;  %v128_v2 = vld [vmem:[%s170_s1 + $0x8] sm:$0xff]  }
   0x2   :  { %118 = vmatpush3.bf16.msra.mxu0 %v127_v1  ;;  %v129_v3 = vld [vmem:[%s171_s0] sm:$0xff]  }
   0x3   :  { %119 = vmatprep.subr.bf16.mxu0 %v130_v0  ;;  %v105_v4 = vld [vmem:[%s172_s2] ss:$0 sm:$0xff] }
   0x6   :  { %120 = vmatpush3.bf16.msra.mxu0 %v128_v2 }
   0x9   :  { %122 = vmatmul.mubr.msk.bf16.vlgmr.msra.gmra.mrb[0].mxu0 %vm45_vm1, %v129_v3 }
  0xdc   :  { %v83_v5 = vpop.f32.mrb[0].mxu0 }
  0xdd   :  { %v84_v6 = vadd.f32 %v105_v4, %v83_v5  ;;  %v123_v7 = vpop.f32.mrb[1].mxu0 }
  0xde   :  { %v86_v8 = vpop.f32.mrb[2].mxu0 }
  0xdf   :  { %v112_v9 = vpack.c.bf16 %v84_v6, %v84_v6  ;;  %v87_v10 = vadd.f32 %v105_v4, %v86_v8  ;;  %v124_v11 = vpop.f32.mrb[3].mxu0 }
  0xe1   :  { %99 = vst.msk [vmem:[%s173_s3] sm:$0xf] %vm98_vm2, %v112_v9  ;;  %v113_v12 = vpack.c.bf16 %v87_v10, %v87_v10 }
  0xe3   :  { %100 = vst.msk [vmem:[%s173_s3 + $0x4] sm:$0xf] %vm98_vm2, %v113_v12 }

// kernel: attention_forward.5
= control target key start
LH: loop header
LB: loop body
LE: loop exit
PB: predicated region body
PF: predicated region fallthrough
CT: control target
= control target key end

     0   :  { %v157_v1 = vmov 0.0   ;;  %vm158_vm0 = vmmov 0   ;;  %s206_s0 = inlined_call_operand.vmem [shape: bf16[16,32], index: 0, kind: input, shape index: {}]   ;;  %s207_s1 = inlined_call_operand.vmem [shape: bf16[32,32], index: 1, kind: input, shape index: {}]   ;;  %s208_s2 = inlined_call_operand.vmem [shape: f32[1,32], index: 2, kind: input, shape index: {}]   ;;  %s209_s3 = inlined_call_operand.hbm [shape: f32[16,32], index: 3, kind: output, shape index: {}]  }
   0x1   :  { %v130_v0 = vld [vmem:[%s207_s1] sm:$0xff]   ;;  %117 = vmatprep.subr.bf16.mxu0 %v157_v1  ;;  %v131_v2 = vld [vmem:[%s207_s1 + $0x8] sm:$0xff]   ;;  %121 = vmatprep.mubr.msk.bf16.mxu0 %vm158_vm0, %v157_v1 }
   0x2   :  { %118 = vmatpush3.bf16.msra.mxu0 %v130_v0 }
   0x3   :  { %119 = vmatprep.subr.bf16.mxu0 %v157_v1 }
   0x4   :  { %8 = vsyncpa [#allocation3], 0  ;;  %v132_v3 = vld [vmem:[%s206_s0] sm:$0xff]   ;;  %vm46_vm1 = vcmask 261120   ;;  %s159_s20 = smov [#allocation2]  }
   0x5   :  { %v109_v4 = vld [vmem:[%s208_s2] ss:$0 sm:$0xff]  ;;  %s98_s21 = sshll.u32 %s159_s20, 4  ;;  %s99_s21 = int_to_ptr.vmem [resolvable:$true] %s98_s21 }
   0x6   :  { %120 = vmatpush3.bf16.msra.mxu0 %v131_v2  ;;  %s133_s1 = scalar_lea.vmem %s99_s21, 256  ;;  %p138_p1 = scmp.lt.s32.totalorder %s99_s21, %s99_s21 }
   0x7   :  { %p134_p0 = scmp.ne.s32.totalorder %s99_s21, %s133_s1  ;;  %p139_p2 = scmp.lt.s32.totalorder %s133_s1, %s133_s1 }
   0x9   :  { %122 = vmatmul.mubr.msk.bf16.vlgmr.msra.gmra.mrb[0].mxu0 %vm46_vm1, %v132_v3  ;;  %p140_p3 = por %p139_p2, %p138_p1 }
   0xb   :  { %p141_p4 = pnand %p140_p3, %p134_p0 }
  0xdc   :  { %v84_v5 = vpop.f32.mrb[0].mxu0 }
  0xdd   :  { %v85_v6 = vadd.f32 %v109_v4, %v84_v5  ;;  %v123_v7 = vpop.f32.mrb[1].mxu0 }
  0xde   :  { %v87_v8 = vpop.f32.mrb[2].mxu0 }
  0xdf   :  { %91 = vst.msk [vmem:[#allocation2] sm:$0xff] %vm46_vm1, %v85_v6  ;;  %v88_v9 = vadd.f32 %v109_v4, %v87_v8  ;;  %v124_v10 = vpop.f32.mrb[3].mxu0 }
  0xe1   :  { %92 = vst.msk [vmem:[#allocation2 + $0x8] sm:$0xff] %vm46_vm1, %v88_v9 }
  0xe2   :  { %144 = shalt.err (!%p141_p4)
}
  0xe3   :  { %s145_s22 = scalar_lea.hbm %s209_s3, 256 }
  0xe4   :  { %p146_p5 = scmp.ne.s32.totalorder %s209_s3, %s145_s22  ;;  %p149_p6 = scmp.lt.u32.totalorder %s145_s22, %s209_s3 }
  0xe6   :  { %p151_p7 = pnand %p149_p6, %p146_p5 }
  0xe8   :  { %154 = shalt.err (!%p151_p7)
}
  0xe9   :  { %s160_s27 = smov 128   ;;  %s161_s28 = smov 8  }
  0xea   :  { %104 = dma.vmem_to_hbm [thread:$0]  %s99_s21, 256, %s209_s3, [#allocation3], %s160_s27, %s160_s27, %s161_s28  }
  0xeb   :  { %155 = dma.done.wait [#allocation3], 256  }
  0xec   :  { %156 = vsyncadd [#allocation3], 4294967040 }
  0xed   :  { %108 = vsyncpa [#allocation3], 1 }

// kernel: attention_forward.4
= control target key start
LH: loop header
LB: loop body
LE: loop exit
PB: predicated region body
PF: predicated region fallthrough
CT: control target
= control target key end

     0   :  { %s875_s6 = smov 0   ;;  %s877_s7 = smov 0   ;;  %s977_s0 = inlined_call_operand.vmem [shape: bf16[2,8,96], index: 0, kind: input, shape index: {}]   ;;  %s978_s1 = inlined_call_operand.vmem [shape: bf16[2,8,32], index: 1, kind: output, shape index: {}]  }
   0x1   :  { %s879_s8 = smov 0  }
   0x2 LB: > { %s23_s9 = sadd.s32 1, %s843_s7  ;;  %p690_p0 = scmp.ge.s32.totalorder %s847_s8, 1  ;;  %s847_s8 = sphi %s879_s8, %s11_s8   ;;  %s843_s7 = sphi %s877_s7, %s980_s7   ;;  %s839_s6 = sphi %s875_s6, %s979_s6  }
   0x3   : > { %p25_p1 = scmp.ge.s32.totalorder %s23_s9, 2  ;;  %p105_p2 = scmp.lt.s32.totalorder %s847_s8, 3 }
   0x5   : > { %s982_s9 = smov (%p25_p1, %s23_s9), 0  ;;  %p106_p3 = pnand %p690_p0, %p105_p2 }
   0x6   : > { %p129_p4 = scmp.lt.s32.totalorder (!%p106_p3), %s839_s6, 1  ;;  %v849_v0 = vmov (!%p106_p3), 0.0   ;;  %vm850_vm0 = vmmov (!%p106_p3), 0   ;;  %s851_s14 = smov (!%p106_p3), 96   ;;  %vm153_vm1 = vcmask (!%p106_p3), 64512   ;;  %vm217_vm2 = vcmask (!%p106_p3), 1043456  }
   0x7   : > { %109 = sbr.rel (%p106_p3) target bundleno = 1599 (0x63f), region = 24  ;;  %720 = vmatprep.subr.bf16.mxu0 (!%p106_p3), %v849_v0  ;;  %722 = vmatprep.mubr.msk.bf16.mxu0 (!%p106_p3), %vm850_vm0, %v849_v0  ;;  %s852_s15 = smov (!%p106_p3), 64   ;;  %vm605_vm3 = vcmask (!%p106_p3), 130048   ;;  %vm607_vm4 = vcmask (!%p106_p3), 195584   ;;  %vm610_vm5 = vcmask (!%p106_p3), 257024  }
   0x8   : > { %726 = vmatprep.subr.bf16.mxu1 (!%p106_p3), %v849_v0  ;;  %728 = vmatprep.mubr.msk.bf16.mxu1 (!%p106_p3), %vm850_vm0, %v849_v0  ;;  %s853_s16 = smov (!%p106_p3), 88   ;;  %s854_s17 = smov (!%p106_p3), 72  }
   0x9   : > { %s855_s18 = smov (!%p106_p3), 120   ;;  %s856_s19 = smov (!%p106_p3), 80  }
   0xa   : > { %s857_s20 = smov (!%p106_p3), 112   ;;  %s858_s21 = smov (!%p106_p3), 104  }
   0xb   : > { %s859_s22 = smov (!%p106_p3), 56   ;;  %s860_s23 = smov (!%p106_p3), 48  }
   0xc   : > { %s861_s24 = smov (!%p106_p3), 40   ;;  %s862_s25 = smov (!%p106_p3), 8  }
   0xd   : > { %s863_s26 = smov (!%p106_p3), 16   ;;  %s864_s27 = smov (!%p106_p3), 24  }
   0xe   : > { %s984_s6 = smov (!%p129_p4, %s839_s6), 1 }
   0xf   : > { %s691_s10 = sshll.u32 %s984_s6, 2 }
  0x10   : > { %s135_s13 = scalar_lea.vmem %s977_s0, %s691_s10  ;;  %s142_s30 = scalar_lea.vmem %s978_s1, %s691_s10 }
  0x11   : > { %v144_v1 = vld [vmem:[%s135_s13] sm:$0xf] }
  0x12   : > { %v907_v2 = vcombine.low %v144_v1, %v144_v1  ;;  %v145_v3 = vunpack.c.l.bf16 %v144_v1 }
  0x14   : > { %151 = vrot.lane.b32.xlu0 %v907_v2, %s851_s14  ;;  %v146_v6 = vmul.f32 0.35355338, %v145_v3  ;;  %212 = vrot.lane.b32.xlu1 %v907_v2, %s852_s15 }
  0x16   : > { %v147_v7 = vpack.c.bf16 %v146_v6, %v146_v6 }
  0x18   : > { %264 = vrot.lane.b32.xlu1 %v907_v2, %s853_s16 }
  0x86   : > { %v152_v4 = vpop.permute.xlu0 %151  ;;  %v213_v13 = vpop.permute.xlu1 %212 }
  0x87   : > { %v158_v5 = vsel %vm153_vm1, %v152_v4, 0  ;;  %v219_v14 = vsel %vm217_vm2, %v213_v13, 0 }
  0x88   : > { %721 = vmatpush3.bf16.xpose.msra.mxu0 %v158_v5  ;;  %727 = vmatpush3.bf16.msra.mxu1 %v219_v14 }
  0x89   : > { %738 = vmatprep.subr.bf16.mxu0 %v849_v0  ;;  %732 = vmatprep.subr.bf16.mxu1 %v849_v0 }
  0x8a   : > { %v265_v20 = vpop.permute.xlu1 %264 }
  0x8b   : > { %v270_v26 = vsel %vm153_vm1, %v265_v20, 0 }
  0x8f   : > { %723 = vmatmul.mubr.msk.bf16.vlgmr.msra.gmra.mrb[0].mxu0 %vm153_vm1, %v147_v7 }
  0x90   : > { %740 = vmatprep.mubr.msk.bf16.mxu0 %vm850_vm0, %v849_v0 }
 0x162   : > { %v194_v8 = vpop.f32.mrb[0].mxu0 }
 0x163   : > { %v724_v9 = vpop.f32.mrb[1].mxu0  ;;  %v200_v10 = vsel %vm153_vm1, %v194_v8, -inf }
 0x164   : > { %201 = vmax.xlane.f32.xlu0 %v200_v10  ;;  %v197_v11 = vpop.f32.mrb[2].mxu0 }
 0x165   : > { %v725_v12 = vpop.f32.mrb[3].mxu0 }
 0x17a   : > { %484 = vrot.lane.b32.xlu0 %v907_v2, %s854_s17 }
 0x1f1   : > { %v202_v15 = vpop.xlane.xlu0 %201 }
 0x1f2   : > { %v203_v16 = vsub.f32 %v194_v8, %v202_v15 }
 0x1f4   : > { %v204_v17 = vmul.f32 1.442695, %v203_v16 }
 0x1f5   : > { %v485_v29 = vpop.permute.xlu0 %484 }
 0x1f6   : > { %809 = vpow2.f32 %v204_v17  ;;  %v490_v31 = vsel %vm153_vm1, %v485_v29, 0 }
 0x200   : > { %v810_v18 = vpop.eup %809 }
 0x201   : > { %v206_v19 = vsel %vm153_vm1, %v810_v18, 0.0 }
 0x202   : > { %207 = vadd.xlane.f32.xlu1 %v206_v19 }
 0x213   : > { %262 = vrot.lane.b32.xlu1 %v147_v7, %s855_s18 }
 0x217   : > { %374 = vrot.lane.b32.xlu1 %v907_v2, %s856_s19 }
 0x21b   : > { %372 = vrot.lane.b32.xlu1 %v147_v7, %s857_s20 }
 0x21f   : > { %482 = vrot.lane.b32.xlu1 %v147_v7, %s858_s21 }
 0x28f   : > { %v208_v21 = vpop.xlane.xlu1 %207 }
 0x290   : > { %811 = vrcp.f32 %v208_v21 }
 0x293   : > { %v263_v24 = vpop.permute.xlu1 %262 }
 0x297   : > { %v375_v27 = vpop.permute.xlu1 %374 }
 0x298   : > { %v380_v28 = vsel %vm153_vm1, %v375_v27, 0 }
 0x29a   : > { %v812_v22 = vpop.eup %811 }
 0x29b   : > { %v210_v23 = vmul.f32 %v812_v22, %v810_v18  ;;  %v373_v30 = vpop.permute.xlu1 %372 }
 0x29d   : > { %v211_v25 = vpack.c.bf16 %v210_v23, %v210_v23 }
 0x29f   : > { %729 = vmatmul.mubr.msk.bf16.vlgmr.msra.gmra.mrb[0].mxu1 %vm153_vm1, %v211_v25  ;;  %v483_v32 = vpop.permute.xlu1 %482 }
 0x2a0   : > { %733 = vmatpush3.bf16.xpose.msra.mxu1 %v270_v26  ;;  %734 = vmatprep.mubr.msk.bf16.mxu1 %vm850_vm0, %v849_v0 }
 0x2a1   : > { %744 = vmatprep.subr.bf16.mxu1 %v849_v0 }
 0x2a7   : > { %735 = vmatmul.mubr.msk.bf16.vlgmr.msra.gmra.mrb[4].mxu1 %vm153_vm1, %v263_v24 }
 0x2a8   : > { %745 = vmatpush3.bf16.xpose.msra.mxu1 %v380_v28  ;;  %746 = vmatprep.mubr.msk.bf16.mxu1 %vm850_vm0, %v849_v0 }
 0x2a9   : > { %756 = vmatprep.subr.bf16.mxu1 %v849_v0 }
 0x2af   : > { %747 = vmatmul.mubr.msk.bf16.vlgmr.msra.gmra.mrb[8].mxu1 %vm153_vm1, %v373_v30 }
 0x2b0   : > { %757 = vmatpush3.bf16.xpose.msra.mxu1 %v490_v31  ;;  %758 = vmatprep.mubr.msk.bf16.mxu1 %vm850_vm0, %v849_v0 }
 0x2b7   : > { %759 = vmatmul.mubr.msk.bf16.vlgmr.msra.gmra.mrb[12].mxu1 %vm153_vm1, %v483_v32 }
 0x372   : > { %v938_v33 = vpop.f32.mrb[0].mxu1 }
 0x373   : > { %v730_v34 = vpop.f32.mrb[1].mxu1 }
 0x374   : > { %v258_v35 = vpop.f32.mrb[2].mxu1 }
 0x375   : > { %v731_v36 = vpop.f32.mrb[3].mxu1 }
 0x37a   : > { %v306_v37 = vpop.f32.mrb[4].mxu1 }
 0x37b   : > { %v736_v38 = vpop.f32.mrb[5].mxu1  ;;  %v312_v39 = vsel %vm153_vm1, %v306_v37, -inf }
 0x37c   : > { %313 = vmax.xlane.f32.xlu1 %v312_v39  ;;  %v309_v40 = vpop.f32.mrb[6].mxu1 }
 0x37d   : > { %v737_v41 = vpop.f32.mrb[7].mxu1 }
 0x382   : > { %v416_v42 = vpop.f32.mrb[8].mxu1 }
 0x383   : > { %v422_v43 = vsel %vm153_vm1, %v416_v42, -inf  ;;  %v748_v44 = vpop.f32.mrb[9].mxu1 }
 0x384   : > { %423 = vmax.xlane.f32.xlu0 %v422_v43  ;;  %v419_v45 = vpop.f32.mrb[10].mxu1 }
 0x385   : > { %v749_v46 = vpop.f32.mrb[11].mxu1 }
 0x38a   : > { %v526_v47 = vpop.f32.mrb[12].mxu1 }
 0x38b   : > { %v532_v48 = vsel %vm153_vm1, %v526_v47, -inf  ;;  %v760_v49 = vpop.f32.mrb[13].mxu1 }
 0x38c   : > { %533 = vmax.xlane.f32.xlu1 %v532_v48  ;;  %v529_v50 = vpop.f32.mrb[14].mxu1 }
 0x38d   : > { %v761_v51 = vpop.f32.mrb[15].mxu1 }
 0x409   : > { %v314_v52 = vpop.xlane.xlu1 %313 }
 0x40a   : > { %v315_v53 = vsub.f32 %v306_v37, %v314_v52 }
 0x40c   : > { %v316_v54 = vmul.f32 1.442695, %v315_v53 }
 0x40e   : > { %813 = vpow2.f32 %v316_v54 }
 0x411   : > { %v424_v62 = vpop.xlane.xlu0 %423 }
 0x412   : > { %v425_v63 = vsub.f32 %v416_v42, %v424_v62 }
 0x414   : > { %v426_v1 = vmul.f32 1.442695, %v425_v63 }
 0x418   : > { %v814_v55 = vpop.eup %813 }
 0x419   : > { %v534_v56 = vpop.xlane.xlu1 %533  ;;  %v318_v57 = vsel %vm153_vm1, %v814_v55, 0.0 }
 0x41a   : > { %v535_v58 = vsub.f32 %v526_v47, %v534_v56  ;;  %319 = vadd.xlane.f32.xlu1 %v318_v57 }
 0x41c   : > { %v536_v59 = vmul.f32 1.442695, %v535_v58 }
 0x41e   : > { %815 = vpow2.f32 %v536_v59 }
 0x41f   : > { %817 = vpow2.f32 %v426_v1 }
 0x428   : > { %v816_v60 = vpop.eup %815 }
 0x429   : > { %v538_v61 = vsel %vm153_vm1, %v816_v60, 0.0  ;;  %v818_v3 = vpop.eup %817 }
 0x42a   : > { %539 = vadd.xlane.f32.xlu0 %v538_v61  ;;  %v428_v4 = vsel %vm153_vm1, %v818_v3, 0.0 }
 0x42b   : > { %324 = vrot.lane.b32.xlu1 %v907_v2, %s859_s22 }
 0x440   : > { %434 = vrot.lane.b32.xlu0 %v907_v2, %s860_s23 }
 0x44f   : > { %429 = vadd.xlane.f32.xlu1 %v428_v4 }
 0x460   : > { %544 = vrot.lane.b32.xlu1 %v907_v2, %s861_s24 }
 0x4a7   : > { %v320_v5 = vpop.xlane.xlu1 %319 }
 0x4a8   : > { %819 = vrcp.f32 %v320_v5 }
 0x4ab   : > { %v325_v6 = vpop.permute.xlu1 %324 }
 0x4ac   : > { %v330_v7 = vsel %vm217_vm2, %v325_v6, 0 }
 0x4ad   : > { %739 = vmatpush3.bf16.msra.mxu0 %v330_v7 }
 0x4ae   : > { %750 = vmatprep.subr.bf16.mxu0 %v849_v0 }
 0x4b2   : > { %v820_v8 = vpop.eup %819 }
 0x4b3   : > { %v322_v9 = vmul.f32 %v820_v8, %v814_v55 }
 0x4b5   : > { %v323_v10 = vpack.c.bf16 %v322_v9, %v322_v9 }
 0x4b7   : > { %741 = vmatmul.mubr.msk.bf16.vlgmr.msra.gmra.mrb[4].mxu0 %vm153_vm1, %v323_v10  ;;  %v540_v11 = vpop.xlane.xlu0 %539 }
 0x4b8   : > { %752 = vmatprep.mubr.msk.bf16.mxu0 %vm850_vm0, %v849_v0 }
 0x4bb   : > { %v435_v12 = vpop.permute.xlu0 %434 }
 0x4bc   : > { %v440_v2 = vsel %vm217_vm2, %v435_v12, 0 }
 0x4bd   : > { %751 = vmatpush3.bf16.msra.mxu0 %v440_v2 }
 0x4be   : > { %762 = vmatprep.subr.bf16.mxu0 %v849_v0 }
 0x4dc   : > { %v430_v13 = vpop.xlane.xlu1 %429 }
 0x4dd   : > { %821 = vrcp.f32 %v430_v13 }
 0x4de   : > { %823 = vrcp.f32 %v540_v11 }
 0x4e0   : > { %v545_v15 = vpop.permute.xlu1 %544 }
 0x4e1   : > { %v550_v17 = vsel %vm217_vm2, %v545_v15, 0 }
 0x4e7   : > { %v822_v14 = vpop.eup %821 }
 0x4e8   : > { %v432_v16 = vmul.f32 %v822_v14, %v818_v3  ;;  %v824_v19 = vpop.eup %823 }
 0x4e9   : > { %v542_v20 = vmul.f32 %v824_v19, %v816_v60 }
 0x4ea   : > { %v433_v18 = vpack.c.bf16 %v432_v16, %v432_v16 }
 0x4eb   : > { %v543_v21 = vpack.c.bf16 %v542_v20, %v542_v20 }
 0x4ec   : > { %753 = vmatmul.mubr.msk.bf16.vlgmr.msra.gmra.mrb[8].mxu0 %vm153_vm1, %v433_v18 }
 0x4ed   : > { %763 = vmatpush3.bf16.msra.mxu0 %v550_v17  ;;  %764 = vmatprep.mubr.msk.bf16.mxu0 %vm850_vm0, %v849_v0 }
 0x4f4   : > { %765 = vmatmul.mubr.msk.bf16.vlgmr.msra.gmra.mrb[12].mxu0 %vm153_vm1, %v543_v21 }
 0x58a   : > { %v366_v22 = vpop.f32.mrb[4].mxu0 }
 0x58b   : > { %593 = vrot.lane.b32.xlu1 %v366_v22, %s862_s25  ;;  %v742_v23 = vpop.f32.mrb[5].mxu0 }
 0x58c   : > { %v369_v24 = vpop.f32.mrb[6].mxu0 }
 0x58d   : > { %v743_v25 = vpop.f32.mrb[7].mxu0 }
 0x5bf   : > { %v476_v26 = vpop.f32.mrb[8].mxu0 }
 0x5c0   : > { %597 = vrot.lane.b32.xlu0 %v476_v26, %s863_s26  ;;  %v754_v27 = vpop.f32.mrb[9].mxu0 }
 0x5c1   : > { %v479_v28 = vpop.f32.mrb[10].mxu0 }
 0x5c2   : > { %v755_v29 = vpop.f32.mrb[11].mxu0 }
 0x5c7   : > { %v586_v30 = vpop.f32.mrb[12].mxu0 }
 0x5c8   : > { %601 = vrot.lane.b32.xlu1 %v586_v30, %s864_s27  ;;  %v766_v0 = vpop.f32.mrb[13].mxu0 }
 0x5c9   : > { %v589_v31 = vpop.f32.mrb[14].mxu0 }
 0x5ca   : > { %v767_v32 = vpop.f32.mrb[15].mxu0 }
 0x5fd   : > { %v594_v34 = vpop.permute.xlu1 %593 }
 0x5fe   : > { %v604_v36 = vsel %vm153_vm1, %v938_v33, %v594_v34 }
 0x632   : > { %v598_v35 = vpop.permute.xlu0 %597 }
 0x633   : > { %v606_v37 = vsel %vm605_vm3, %v604_v36, %v598_v35 }
 0x63a   : > { %v602_v38 = vpop.permute.xlu1 %601 }
 0x63b   : > { %v608_v39 = vsel %vm607_vm4, %v606_v37, %v602_v38 }
 0x63c   : > { %v609_v40 = vpack.c.bf16 %v608_v39, %v608_v39 }
 0x63e   : > { %611 = vst.msk [vmem:[%s142_s30] sm:$0xf] %vm610_vm5, %v609_v40 }
 0x63f PF: > { %s11_s8 = sadd.s32 1, %s847_s8   ;;  %s979_s6 = smov %s843_s7 }
 0x640   : > { %p8_p5 = scmp.ge.s32.totalorder %s11_s8, 4   ;;  %s980_s7 = smov %s982_s9 }
 0x642   :  { %10 = sbr.rel (!%p8_p5) target bundleno = 2 (0x2), region = 54 }

</bundles_post_ra>
